<compile_context>
chip_gen: v5e
topology: v5e:2x2
jax: 0.10.0
libtpu: 0.0.40
codegen_flags: <defaults>
</compile_context>

<pallas_src>
import math
import functools

import jax
import jax.numpy as jnp
from jax.experimental import pallas as pl
from jax.experimental.pallas import tpu as pltpu


def cross_attention_kernel(x_ref, enc_ref,
                           wq_ref, bq_ref, wkv_ref, bkv_ref, wp_ref, bp_ref,
                           y_ref, *rest, n_head, compute_att):
    """One (batch-block, query-tile) per grid step.

    x_ref:   (Bb, Tq, C)       query-side input tile
    enc_ref: (Bb, T_E, D)      encoder output (condition), constant over q tiles
    wq_ref:  (C, C)            query weight, pre-transposed, scale pre-folded
    bq_ref:  (1, C)            query bias (f32), scale pre-folded
    wkv_ref: (D, 2C)           fused key|value weight, pre-transposed
    bkv_ref: (1, 2C)           fused key|value bias (f32)
    wp_ref:  (C, C)            output projection weight, pre-transposed
    bp_ref:  (1, C)            output projection bias (f32)
    y_ref:   (Bb, Tq, C)       output tile
    rest:    [att_ref (Bb,Tq,T_E)] + [k_scratch, v_scratch] (head-major K/V)
    """
    if compute_att:
        att_ref, k_sc, v_sc = rest
    else:
        k_sc, v_sc = rest

    Bb, Tq, C = x_ref.shape
    _, T_E, D = enc_ref.shape
    hs = C // n_head
    mdt = wq_ref.dtype                       # MXU operand dtype (bf16 or f32)

    # ---- K/V: project + head-major relayout ONCE per batch block -----------
    @pl.when(pl.program_id(1) == 0)
    def _():
        e2 = enc_ref[...].reshape(Bb * T_E, D).astype(mdt)
        kv = (jnp.dot(e2, wkv_ref[...], preferred_element_type=jnp.float32)
              + bkv_ref[...]).astype(mdt)
        k = kv[:, :C]
        v = kv[:, C:]
        for h in range(n_head):              # relayout only; no MXU work here
            lo = h * hs
            k_sc[h * Bb:(h + 1) * Bb] = k[:, lo:lo + hs].reshape(Bb, T_E, hs)
            v_sc[h * Bb:(h + 1) * Bb] = v[:, lo:lo + hs].reshape(Bb, T_E, hs)

    # ---- Q projection (attention scale pre-folded into wq/bq) --------------
    x2 = x_ref[...].reshape(Bb * Tq, C).astype(mdt)
    q = (jnp.dot(x2, wq_ref[...], preferred_element_type=jnp.float32)
         + bq_ref[...]).astype(mdt)
    # Single up-front relayout to (n_head*Bb, Tq, hs); batch index = h*Bb + b.
    qh = jnp.concatenate(
        [q[:, h * hs:(h + 1) * hs].reshape(Bb, Tq, hs) for h in range(n_head)],
        axis=0)

    # ---- One batched QK^T, softmax (f32), one batched PV -------------------
    s = jnp.einsum("btd,bsd->bts", qh, k_sc[...],
                   preferred_element_type=jnp.float32)           # (H*Bb, Tq, T_E)
    s = s - jnp.max(s, axis=-1, keepdims=True)
    p = jnp.exp(s)
    denom = jnp.sum(p, axis=-1, keepdims=True)
    # Exact reciprocal when the attention map is handed back to the caller,
    # EUP approx reciprocal otherwise.
    p = p * pl.reciprocal(denom, approx=not compute_att)

    yh = jnp.einsum("bts,bsd->btd", p.astype(mdt), v_sc[...],
                    preferred_element_type=jnp.float32)          # (H*Bb, Tq, hs)

    # ---- Heads back to lanes, single K=C output projection ------------------
    y_heads = jnp.concatenate(
        [yh[h * Bb:(h + 1) * Bb].reshape(Bb * Tq, hs) for h in range(n_head)],
        axis=1).astype(mdt)                                       # (Bb*Tq, C)
    y = (jnp.dot(y_heads, wp_ref[...], preferred_element_type=jnp.float32)
         + bp_ref[...])
    y_ref[...] = y.reshape(Bb, Tq, C).astype(y_ref.dtype)

    if compute_att:
        att = p[0:Bb]
        for h in range(1, n_head):
            att = att + p[h * Bb:(h + 1) * Bb]
        att_ref[...] = (att * (1.0 / n_head)).astype(att_ref.dtype)


def _vmem_capacity_bytes():
    try:
        return int(pltpu.get_tpu_info().vmem_capacity_bytes)
    except Exception:
        return 64 * 2 ** 20       # conservative fallback: v7x per-TensorCore VMEM


def _pick_batch_block(B, rows_per_batch, target_rows):
    """Pack batch elements per grid step.  Prefer even step counts (ideally
    >= 4) so v7x's two TensorCores split the 'parallel' batch axis evenly and
    the auto-pipeline has >= 2 steps per core.  No effect on v5e/v6e (1 TC)."""
    divisors = [d for d in range(1, B + 1) if B % d == 0]
    fitting = [d for d in divisors if d * rows_per_batch <= target_rows] or [1]
    for min_steps in (4, 2):
        cand = [d for d in fitting
                if (B // d) >= min_steps and (B // d) % 2 == 0]
        if cand:
            return max(cand)
    return max(fitting)


def _pick_q_block(T, target_rows):
    """Tile the query length only when it is long; tiles must keep the
    second-minor block dim a multiple of 8 (or the full T)."""
    if T <= max(target_rows, 8):
        return T
    cand = [qb for qb in range(8, T, 8) if T % qb == 0 and qb <= target_rows]
    return max(cand) if cand else T


def cross_attention(x, encoder_output, params, n_head, *,
                    return_att=True, batch_block=None, q_block=None,
                    matmul_dtype=None):
    B, T, C = x.shape
    Be, T_E, D = encoder_output.shape
    assert Be == B and C % n_head == 0
    hs = C // n_head
    scale = 1.0 / math.sqrt(hs)
    mdt = jnp.dtype(matmul_dtype) if matmul_dtype is not None else jnp.dtype(x.dtype)

    # Wrapper-side weight prep (constant-folded under jit):
    #  - transpose to (in, out) for row-major MXU matmuls
    #  - fold the attention scale into the query projection
    #  - fuse key|value into a single (D, 2C) projection
    wq = (params["wq"].T * scale).astype(mdt)
    bq = (params["bq"] * scale).reshape(1, C).astype(jnp.float32)
    wkv = jnp.concatenate([params["wk"].T, params["wv"].T], axis=1).astype(mdt)
    bkv = jnp.concatenate([params["bk"], params["bv"]]).reshape(1, 2 * C).astype(jnp.float32)
    wp = params["wp"].T.astype(mdt)
    bp = params["bp"].reshape(1, C).astype(jnp.float32)

    # Generation-aware sizing: 128 MiB parts (v5e/v6e) get bigger slabs than
    # 64 MiB v7x.
    vmem_cap = _vmem_capacity_bytes()
    target_rows = 1024 if vmem_cap >= 96 * 2 ** 20 else 512

    if q_block is None:
        q_block = _pick_q_block(T, target_rows)
    Tq = q_block
    assert T % Tq == 0 and (Tq == T or Tq % 8 == 0)

    if batch_block is None:
        batch_block = _pick_batch_block(B, max(Tq, T_E), target_rows)
    Bb = batch_block
    assert B % Bb == 0

    # Rough VMEM budget: single-buffered weights + double-buffered IO blocks +
    # K/V scratch + live f32 intermediates, clamped to 80% of this device's
    # physical VMEM (v7x: 64 MiB, v5e/v6e: 128 MiB).
    in_isz = jnp.dtype(x.dtype).itemsize
    m_isz = mdt.itemsize
    weight_b = ((wq.size + wkv.size + wp.size) * m_isz
                + (bq.size + bkv.size + bp.size) * 4)
    io_b = 2 * ((Bb * Tq * C + Bb * T_E * D + Bb * Tq * C) * in_isz
                + (Bb * Tq * T_E * 4 if return_att else 0))
    kv_scratch_b = 2 * Bb * T_E * C * m_isz
    live_b = 4 * (2 * Bb * Tq * C + 2 * Bb * T_E * C + 3 * n_head * Bb * Tq * T_E)
    vmem_limit = int(min(int(0.8 * vmem_cap),
                         max(32 * 2 ** 20,
                             3 * (weight_b + io_b + kv_scratch_b + live_b))))

    def const_spec(shape):
        zeros = (0,) * len(shape)
        idx = lambda i, j, _z=zeros: _z
        try:   # weights never change across the grid -> single buffer
            return pl.BlockSpec(shape, idx, pipeline_mode=pl.Buffered(1))
        except TypeError:
            return pl.BlockSpec(shape, idx)

    in_specs = [
        pl.BlockSpec((Bb, Tq, C), lambda i, j: (i, j, 0)),      # x
        pl.BlockSpec((Bb, T_E, D), lambda i, j: (i, 0, 0)),     # encoder_output
        const_spec((C, C)), const_spec((1, C)),                 # query  weight / bias
        const_spec((D, 2 * C)), const_spec((1, 2 * C)),         # key|value weight / bias
        const_spec((C, C)), const_spec((1, C)),                 # proj   weight / bias
    ]
    out_shape = [jax.ShapeDtypeStruct((B, T, C), x.dtype)]
    out_specs = [pl.BlockSpec((Bb, Tq, C), lambda i, j: (i, j, 0))]
    if return_att:
        out_shape.append(jax.ShapeDtypeStruct((B, T, T_E), jnp.float32))
        out_specs.append(pl.BlockSpec((Bb, Tq, T_E), lambda i, j: (i, j, 0)))

    kernel = functools.partial(cross_attention_kernel,
                               n_head=n_head, compute_att=return_att)
    outs = pl.pallas_call(
        kernel,
        out_shape=tuple(out_shape),
        grid_spec=pltpu.PrefetchScalarGridSpec(
            num_scalar_prefetch=0,
            grid=(B // Bb, T // Tq),
            in_specs=in_specs,
            out_specs=tuple(out_specs),
            scratch_shapes=[
                pltpu.VMEM((n_head * Bb, T_E, hs), mdt),   # K, head-major
                pltpu.VMEM((n_head * Bb, T_E, hs), mdt),   # V, head-major
            ],
        ),
        compiler_params=pltpu.CompilerParams(
            # batch axis -> megacore; query-tile axis carries the K/V scratch.
            dimension_semantics=("parallel", "arbitrary"),
            vmem_limit_bytes=vmem_limit,
        ),
    )(x, encoder_output, wq, bq, wkv, bkv, wp, bp)

    if return_att:
        return outs[0], outs[1]
    return outs[0], None


def cross_attention_ref(x, enc, params, n_head):
    """Plain-JAX reference mirroring the PyTorch forward (dropout = identity)."""
    B, T, C = x.shape
    _, T_E, _ = enc.shape
    hs = C // n_head
    k = enc @ params["wk"].T + params["bk"]
    q = x @ params["wq"].T + params["bq"]
    v = enc @ params["wv"].T + params["bv"]
    k = k.reshape(B, T_E, n_head, hs).transpose(0, 2, 1, 3)
    q = q.reshape(B, T, n_head, hs).transpose(0, 2, 1, 3)
    v = v.reshape(B, T_E, n_head, hs).transpose(0, 2, 1, 3)
    att = (q @ jnp.swapaxes(k, -2, -1)) * (1.0 / math.sqrt(hs))
    att = jax.nn.softmax(att, axis=-1)
    y = att @ v
    y = y.transpose(0, 2, 1, 3).reshape(B, T, C)
    att_mean = att.mean(axis=1)
    y = y @ params["wp"].T + params["bp"]
    return y, att_mean


if __name__ == "__main__":
    def make_params(key, n_embd, condition_embd):
        ks = jax.random.split(key, 8)
        return {
            "wk": 0.1 * jax.random.normal(ks[0], (n_embd, condition_embd), jnp.float32),
            "bk": 0.05 * jax.random.normal(ks[1], (n_embd,), jnp.float32),
            "wq": 0.1 * jax.random.normal(ks[2], (n_embd, n_embd), jnp.float32),
            "bq": 0.05 * jax.random.normal(ks[3], (n_embd,), jnp.float32),
            "wv": 0.1 * jax.random.normal(ks[4], (n_embd, condition_embd), jnp.float32),
            "bv": 0.05 * jax.random.normal(ks[5], (n_embd,), jnp.float32),
            "wp": 0.1 * jax.random.normal(ks[6], (n_embd, n_embd), jnp.float32),
            "bp": 0.05 * jax.random.normal(ks[7], (n_embd,), jnp.float32),
        }

    key = jax.random.PRNGKey(0)
    kp, kx1, ke1, kx2, ke2, kx3, ke3 = jax.random.split(key, 7)

    # condition_embd != n_embd on purpose (exercises the D != C spec binding).
    n_embd, condition_embd, n_head = 32, 48, 4
    params = make_params(kp, n_embd, condition_embd)

    # Tolerances: the plain-JAX reference runs XLA's default f32 matmul
    # precision while the kernel accumulates in f32 on the MXU, so the two
    # sides can differ at the ~1e-3 level even for "f32" matmuls.
    TOL_F32 = dict(atol=1e-2, rtol=1e-2)
    TOL_BF16 = dict(atol=5e-2, rtol=5e-2)

    # Case 1: tiny batch, single query tile, exact-reciprocal softmax
    # (attention map returned).
    B, T, T_E = 2, 8, 16
    x = jax.random.normal(kx1, (B, T, n_embd), jnp.float32)
    enc = jax.random.normal(ke1, (B, T_E, condition_embd), jnp.float32)
    y, att = cross_attention(x, enc, params, n_head)
    jax.block_until_ready((y, att))
    y_ref, att_ref = cross_attention_ref(x, enc, params, n_head)
    assert jnp.allclose(y, y_ref, **TOL_F32), "case1 y mismatch"
    assert jnp.allclose(att, att_ref, **TOL_F32), "case1 att mismatch"

    # Case 2: larger batch packed into batch blocks + query-tiled grid axis
    # (K/V scratch is computed once per batch block and reused across the two
    # query tiles).
    B2, T2 = 8, 16
    x2 = jax.random.normal(kx2, (B2, T2, n_embd), jnp.float32)
    enc2 = jax.random.normal(ke2, (B2, T_E, condition_embd), jnp.float32)
    y2, att2 = cross_attention(x2, enc2, params, n_head, q_block=8)
    jax.block_until_ready((y2, att2))
    y2_ref, att2_ref = cross_attention_ref(x2, enc2, params, n_head)
    assert jnp.allclose(y2, y2_ref, **TOL_F32), "case2 y mismatch"
    assert jnp.allclose(att2, att2_ref, **TOL_F32), "case2 att mismatch"

    # Case 3: f32 inputs, bf16 MXU operands (f32 accumulation), no attention
    # output (approx-reciprocal softmax path, y-only store).
    B3 = 4
    x3 = jax.random.normal(kx3, (B3, T, n_embd), jnp.float32)
    enc3 = jax.random.normal(ke3, (B3, T_E, condition_embd), jnp.float32)
    y3, att3 = cross_attention(x3, enc3, params, n_head,
                               return_att=False, matmul_dtype=jnp.bfloat16)
    jax.block_until_ready(y3)
    assert att3 is None
    y3_ref, _ = cross_attention_ref(x3, enc3, params, n_head)
    assert jnp.allclose(y3, y3_ref, **TOL_BF16), "case3 y mismatch"

    print("KERNEL_OK")
</pallas_src>

<mosaic_0001>
module attributes {stable_mosaic.version = 11 : i64} {
  func.func @cross_attention_kernel(%arg0: i32, %arg1: i32, %arg2: memref<1x8x32xf32, #tpu.memory_space<vmem>>, %arg3: memref<1x16x48xf32, #tpu.memory_space<vmem>>, %arg4: memref<32x32xf32, #tpu.memory_space<vmem>>, %arg5: memref<1x32xf32, #tpu.memory_space<vmem>>, %arg6: memref<48x64xf32, #tpu.memory_space<vmem>>, %arg7: memref<1x64xf32, #tpu.memory_space<vmem>>, %arg8: memref<32x32xf32, #tpu.memory_space<vmem>>, %arg9: memref<1x32xf32, #tpu.memory_space<vmem>>, %arg10: memref<1x8x32xf32, #tpu.memory_space<vmem>>, %arg11: memref<1x8x16xf32, #tpu.memory_space<vmem>>, %arg12: memref<4x16x8xf32, #tpu.memory_space<vmem>>, %arg13: memref<4x16x8xf32, #tpu.memory_space<vmem>>) attributes {dimension_semantics = [#tpu.dimension_semantics<parallel>, #tpu.dimension_semantics<arbitrary>], iteration_bounds = array<i64: 2, 1>, scalar_prefetch = 0 : i64, scratch_operands = 2 : i64, tpu.core_type = #tpu.core_type<tc>, window_params = [{transform_indices = @transform_0, window_bounds = array<i64: 1, 8, 32>}, {transform_indices = @transform_1, window_bounds = array<i64: 1, 16, 48>}, {pipeline_mode = #tpu.pipeline_mode<synchronous>, transform_indices = @transform_2, window_bounds = array<i64: 32, 32>}, {pipeline_mode = #tpu.pipeline_mode<synchronous>, transform_indices = @transform_3, window_bounds = array<i64: 1, 32>}, {pipeline_mode = #tpu.pipeline_mode<synchronous>, transform_indices = @transform_4, window_bounds = array<i64: 48, 64>}, {pipeline_mode = #tpu.pipeline_mode<synchronous>, transform_indices = @transform_5, window_bounds = array<i64: 1, 64>}, {pipeline_mode = #tpu.pipeline_mode<synchronous>, transform_indices = @transform_6, window_bounds = array<i64: 32, 32>}, {pipeline_mode = #tpu.pipeline_mode<synchronous>, transform_indices = @transform_7, window_bounds = array<i64: 1, 32>}, {transform_indices = @transform_8, window_bounds = array<i64: 1, 8, 32>}, {transform_indices = @transform_9, window_bounds = array<i64: 1, 8, 16>}]} {
    %c0_i32 = arith.constant 0 : i32
    %0 = arith.cmpi eq, %arg1, %c0_i32 : i32
    %1 = arith.extui %0 : i1 to i32
    %c0_i32_0 = arith.constant 0 : i32
    %2 = arith.cmpi ne, %1, %c0_i32_0 : i32
    scf.if %2 {
      %c0_29 = arith.constant 0 : index
      %c0_30 = arith.constant 0 : index
      %c0_31 = arith.constant 0 : index
      %59 = vector.load %arg3[%c0_29, %c0_30, %c0_31] : memref<1x16x48xf32, #tpu.memory_space<vmem>>, vector<1x16x48xf32>
      %60 = vector.shape_cast %59 : vector<1x16x48xf32> to vector<16x48xf32>
      %c0_32 = arith.constant 0 : index
      %c0_33 = arith.constant 0 : index
      %61 = vector.load %arg6[%c0_32, %c0_33] : memref<48x64xf32, #tpu.memory_space<vmem>>, vector<48x64xf32>
      %cst_34 = arith.constant dense<0.000000e+00> : vector<16x64xf32>
      %62 = tpu.matmul %60, %61, %cst_34 {dimension_numbers = #tpu.dot_dimension_numbers<[1], [0], [0], [1], [0, 0, 1, 1], [], []>} : vector<16x48xf32>, vector<48x64xf32>, vector<16x64xf32> -> vector<16x64xf32>
      %c0_35 = arith.constant 0 : index
      %c0_36 = arith.constant 0 : index
      %63 = vector.load %arg7[%c0_35, %c0_36] : memref<1x64xf32, #tpu.memory_space<vmem>>, vector<1x64xf32>
      %64 = vector.broadcast %63 : vector<1x64xf32> to vector<16x64xf32>
      %65 = arith.addf %62, %64 : vector<16x64xf32>
      %66 = vector.extract_strided_slice %65 {offsets = [0, 0], sizes = [16, 32], strides = [1, 1]} : vector<16x64xf32> to vector<16x32xf32>
      %67 = vector.extract_strided_slice %65 {offsets = [0, 32], sizes = [16, 32], strides = [1, 1]} : vector<16x64xf32> to vector<16x32xf32>
      %68 = vector.extract_strided_slice %66 {offsets = [0, 0], sizes = [16, 8], strides = [1, 1]} : vector<16x32xf32> to vector<16x8xf32>
      %69 = vector.shape_cast %68 : vector<16x8xf32> to vector<1x16x8xf32>
      %c0_37 = arith.constant 0 : index
      %c0_38 = arith.constant 0 : index
      %c0_39 = arith.constant 0 : index
      %70 = vector.load %arg12[%c0_37, %c0_38, %c0_39] : memref<4x16x8xf32, #tpu.memory_space<vmem>>, vector<1x16x8xf32>
      tpu.vector_store %arg12[%c0_37, %c0_38, %c0_39], %69 {strides = array<i32>} : memref<4x16x8xf32, #tpu.memory_space<vmem>>, vector<1x16x8xf32>,
      %71 = vector.extract_strided_slice %67 {offsets = [0, 0], sizes = [16, 8], strides = [1, 1]} : vector<16x32xf32> to vector<16x8xf32>
      %72 = vector.shape_cast %71 : vector<16x8xf32> to vector<1x16x8xf32>
      %c0_40 = arith.constant 0 : index
      %c0_41 = arith.constant 0 : index
      %c0_42 = arith.constant 0 : index
      %73 = vector.load %arg13[%c0_40, %c0_41, %c0_42] : memref<4x16x8xf32, #tpu.memory_space<vmem>>, vector<1x16x8xf32>
      tpu.vector_store %arg13[%c0_40, %c0_41, %c0_42], %72 {strides = array<i32>} : memref<4x16x8xf32, #tpu.memory_space<vmem>>, vector<1x16x8xf32>,
      %74 = vector.extract_strided_slice %66 {offsets = [0, 8], sizes = [16, 8], strides = [1, 1]} : vector<16x32xf32> to vector<16x8xf32>
      %75 = vector.shape_cast %74 : vector<16x8xf32> to vector<1x16x8xf32>
      %c1 = arith.constant 1 : index
      %c0_43 = arith.constant 0 : index
      %c0_44 = arith.constant 0 : index
      %76 = vector.load %arg12[%c1, %c0_43, %c0_44] : memref<4x16x8xf32, #tpu.memory_space<vmem>>, vector<1x16x8xf32>
      tpu.vector_store %arg12[%c1, %c0_43, %c0_44], %75 {strides = array<i32>} : memref<4x16x8xf32, #tpu.memory_space<vmem>>, vector<1x16x8xf32>,
      %77 = vector.extract_strided_slice %67 {offsets = [0, 8], sizes = [16, 8], strides = [1, 1]} : vector<16x32xf32> to vector<16x8xf32>
      %78 = vector.shape_cast %77 : vector<16x8xf32> to vector<1x16x8xf32>
      %c1_45 = arith.constant 1 : index
      %c0_46 = arith.constant 0 : index
      %c0_47 = arith.constant 0 : index
      %79 = vector.load %arg13[%c1_45, %c0_46, %c0_47] : memref<4x16x8xf32, #tpu.memory_space<vmem>>, vector<1x16x8xf32>
      tpu.vector_store %arg13[%c1_45, %c0_46, %c0_47], %78 {strides = array<i32>} : memref<4x16x8xf32, #tpu.memory_space<vmem>>, vector<1x16x8xf32>,
      %80 = vector.extract_strided_slice %66 {offsets = [0, 16], sizes = [16, 8], strides = [1, 1]} : vector<16x32xf32> to vector<16x8xf32>
      %81 = vector.shape_cast %80 : vector<16x8xf32> to vector<1x16x8xf32>
      %c2 = arith.constant 2 : index
      %c0_48 = arith.constant 0 : index
      %c0_49 = arith.constant 0 : index
      %82 = vector.load %arg12[%c2, %c0_48, %c0_49] : memref<4x16x8xf32, #tpu.memory_space<vmem>>, vector<1x16x8xf32>
      tpu.vector_store %arg12[%c2, %c0_48, %c0_49], %81 {strides = array<i32>} : memref<4x16x8xf32, #tpu.memory_space<vmem>>, vector<1x16x8xf32>,
      %83 = vector.extract_strided_slice %67 {offsets = [0, 16], sizes = [16, 8], strides = [1, 1]} : vector<16x32xf32> to vector<16x8xf32>
      %84 = vector.shape_cast %83 : vector<16x8xf32> to vector<1x16x8xf32>
      %c2_50 = arith.constant 2 : index
      %c0_51 = arith.constant 0 : index
      %c0_52 = arith.constant 0 : index
      %85 = vector.load %arg13[%c2_50, %c0_51, %c0_52] : memref<4x16x8xf32, #tpu.memory_space<vmem>>, vector<1x16x8xf32>
      tpu.vector_store %arg13[%c2_50, %c0_51, %c0_52], %84 {strides = array<i32>} : memref<4x16x8xf32, #tpu.memory_space<vmem>>, vector<1x16x8xf32>,
      %86 = vector.extract_strided_slice %66 {offsets = [0, 24], sizes = [16, 8], strides = [1, 1]} : vector<16x32xf32> to vector<16x8xf32>
      %87 = vector.shape_cast %86 : vector<16x8xf32> to vector<1x16x8xf32>
      %c3 = arith.constant 3 : index
      %c0_53 = arith.constant 0 : index
      %c0_54 = arith.constant 0 : index
      %88 = vector.load %arg12[%c3, %c0_53, %c0_54] : memref<4x16x8xf32, #tpu.memory_space<vmem>>, vector<1x16x8xf32>
      tpu.vector_store %arg12[%c3, %c0_53, %c0_54], %87 {strides = array<i32>} : memref<4x16x8xf32, #tpu.memory_space<vmem>>, vector<1x16x8xf32>,
      %89 = vector.extract_strided_slice %67 {offsets = [0, 24], sizes = [16, 8], strides = [1, 1]} : vector<16x32xf32> to vector<16x8xf32>
      %90 = vector.shape_cast %89 : vector<16x8xf32> to vector<1x16x8xf32>
      %c3_55 = arith.constant 3 : index
      %c0_56 = arith.constant 0 : index
      %c0_57 = arith.constant 0 : index
      %91 = vector.load %arg13[%c3_55, %c0_56, %c0_57] : memref<4x16x8xf32, #tpu.memory_space<vmem>>, vector<1x16x8xf32>
      tpu.vector_store %arg13[%c3_55, %c0_56, %c0_57], %90 {strides = array<i32>} : memref<4x16x8xf32, #tpu.memory_space<vmem>>, vector<1x16x8xf32>,
    } else {
    }
    %c0 = arith.constant 0 : index
    %c0_1 = arith.constant 0 : index
    %c0_2 = arith.constant 0 : index
    %3 = vector.load %arg2[%c0, %c0_1, %c0_2] : memref<1x8x32xf32, #tpu.memory_space<vmem>>, vector<1x8x32xf32>
    %4 = vector.shape_cast %3 : vector<1x8x32xf32> to vector<8x32xf32>
    %c0_3 = arith.constant 0 : index
    %c0_4 = arith.constant 0 : index
    %5 = vector.load %arg4[%c0_3, %c0_4] : memref<32x32xf32, #tpu.memory_space<vmem>>, vector<32x32xf32>
    %cst = arith.constant dense<0.000000e+00> : vector<8x32xf32>
    %6 = tpu.matmul %4, %5, %cst {dimension_numbers = #tpu.dot_dimension_numbers<[1], [0], [0], [1], [0, 0, 1, 1], [], []>} : vector<8x32xf32>, vector<32x32xf32>, vector<8x32xf32> -> vector<8x32xf32>
    %c0_5 = arith.constant 0 : index
    %c0_6 = arith.constant 0 : index
    %7 = vector.load %arg5[%c0_5, %c0_6] : memref<1x32xf32, #tpu.memory_space<vmem>>, vector<1x32xf32>
    %8 = vector.broadcast %7 : vector<1x32xf32> to vector<8x32xf32>
    %9 = arith.addf %6, %8 : vector<8x32xf32>
    %10 = vector.extract_strided_slice %9 {offsets = [0, 0], sizes = [8, 8], strides = [1, 1]} : vector<8x32xf32> to vector<8x8xf32>
    %11 = vector.shape_cast %10 : vector<8x8xf32> to vector<1x8x8xf32>
    %12 = vector.extract_strided_slice %9 {offsets = [0, 8], sizes = [8, 8], strides = [1, 1]} : vector<8x32xf32> to vector<8x8xf32>
    %13 = vector.shape_cast %12 : vector<8x8xf32> to vector<1x8x8xf32>
    %14 = vector.extract_strided_slice %9 {offsets = [0, 16], sizes = [8, 8], strides = [1, 1]} : vector<8x32xf32> to vector<8x8xf32>
    %15 = vector.shape_cast %14 : vector<8x8xf32> to vector<1x8x8xf32>
    %16 = vector.extract_strided_slice %9 {offsets = [0, 24], sizes = [8, 8], strides = [1, 1]} : vector<8x32xf32> to vector<8x8xf32>
    %17 = vector.shape_cast %16 : vector<8x8xf32> to vector<1x8x8xf32>
    %18 = tpu.concatenate %11, %13, %15, %17 in 0 : vector<1x8x8xf32>, vector<1x8x8xf32>, vector<1x8x8xf32>, vector<1x8x8xf32> -> vector<4x8x8xf32>
    %c0_7 = arith.constant 0 : index
    %c0_8 = arith.constant 0 : index
    %c0_9 = arith.constant 0 : index
    %19 = vector.load %arg12[%c0_7, %c0_8, %c0_9] : memref<4x16x8xf32, #tpu.memory_space<vmem>>, vector<4x16x8xf32>
    "tpu.trace_start"() <{level = 10 : i32, message = "btd,bsd->bts"}> : () -> ()
    %cst_10 = arith.constant dense<0.000000e+00> : vector<4x8x16xf32>
    %20 = tpu.matmul %18, %19, %cst_10 {dimension_numbers = #tpu.dot_dimension_numbers<[2], [2], [1], [1], [0, 0, 0, 1, 1, 1], [0], [0]>} : vector<4x8x8xf32>, vector<4x16x8xf32>, vector<4x8x16xf32> -> vector<4x8x16xf32>
    "tpu.trace_stop"() : () -> ()
    %cst_11 = arith.constant dense<0xFF800000> : vector<4x8xf32>
    %21 = vector.multi_reduction <maximumf>, %20, %cst_11 [2] : vector<4x8x16xf32> to vector<4x8xf32>
    %22 = vector.shape_cast %21 : vector<4x8xf32> to vector<4x8x1xf32>
    %23 = vector.broadcast %22 : vector<4x8x1xf32> to vector<4x8x16xf32>
    %24 = arith.subf %20, %23 : vector<4x8x16xf32>
    %25 = math.exp %24 : vector<4x8x16xf32>
    %cst_12 = arith.constant dense<0.000000e+00> : vector<4x8xf32>
    %26 = vector.multi_reduction <add>, %25, %cst_12 [2] : vector<4x8x16xf32> to vector<4x8xf32>
    %27 = vector.shape_cast %26 : vector<4x8xf32> to vector<4x8x1xf32>
    %28 = tpu.reciprocal %27 : vector<4x8x1xf32> -> vector<4x8x1xf32>
    %29 = vector.broadcast %28 : vector<4x8x1xf32> to vector<4x8x16xf32>
    %30 = arith.mulf %25, %29 : vector<4x8x16xf32>
    %c0_13 = arith.constant 0 : index
    %c0_14 = arith.constant 0 : index
    %c0_15 = arith.constant 0 : index
    %31 = vector.load %arg13[%c0_13, %c0_14, %c0_15] : memref<4x16x8xf32, #tpu.memory_space<vmem>>, vector<4x16x8xf32>
    "tpu.trace_start"() <{level = 10 : i32, message = "bts,bsd->btd"}> : () -> ()
    %cst_16 = arith.constant dense<0.000000e+00> : vector<4x8x8xf32>
    %32 = tpu.matmul %30, %31, %cst_16 {dimension_numbers = #tpu.dot_dimension_numbers<[2], [1], [1], [2], [0, 0, 0, 1, 1, 2], [0], [0]>} : vector<4x8x16xf32>, vector<4x16x8xf32>, vector<4x8x8xf32> -> vector<4x8x8xf32>
    "tpu.trace_stop"() : () -> ()
    %33 = vector.extract_strided_slice %32 {offsets = [0, 0, 0], sizes = [1, 8, 8], strides = [1, 1, 1]} : vector<4x8x8xf32> to vector<1x8x8xf32>
    %34 = vector.shape_cast %33 : vector<1x8x8xf32> to vector<8x8xf32>
    %35 = vector.extract_strided_slice %32 {offsets = [1, 0, 0], sizes = [1, 8, 8], strides = [1, 1, 1]} : vector<4x8x8xf32> to vector<1x8x8xf32>
    %36 = vector.shape_cast %35 : vector<1x8x8xf32> to vector<8x8xf32>
    %37 = vector.extract_strided_slice %32 {offsets = [2, 0, 0], sizes = [1, 8, 8], strides = [1, 1, 1]} : vector<4x8x8xf32> to vector<1x8x8xf32>
    %38 = vector.shape_cast %37 : vector<1x8x8xf32> to vector<8x8xf32>
    %39 = vector.extract_strided_slice %32 {offsets = [3, 0, 0], sizes = [1, 8, 8], strides = [1, 1, 1]} : vector<4x8x8xf32> to vector<1x8x8xf32>
    %40 = vector.shape_cast %39 : vector<1x8x8xf32> to vector<8x8xf32>
    %41 = tpu.concatenate %34, %36, %38, %40 in 1 : vector<8x8xf32>, vector<8x8xf32>, vector<8x8xf32>, vector<8x8xf32> -> vector<8x32xf32>
    %c0_17 = arith.constant 0 : index
    %c0_18 = arith.constant 0 : index
    %42 = vector.load %arg8[%c0_17, %c0_18] : memref<32x32xf32, #tpu.memory_space<vmem>>, vector<32x32xf32>
    %cst_19 = arith.constant dense<0.000000e+00> : vector<8x32xf32>
    %43 = tpu.matmul %41, %42, %cst_19 {dimension_numbers = #tpu.dot_dimension_numbers<[1], [0], [0], [1], [0, 0, 1, 1], [], []>} : vector<8x32xf32>, vector<32x32xf32>, vector<8x32xf32> -> vector<8x32xf32>
    %c0_20 = arith.constant 0 : index
    %c0_21 = arith.constant 0 : index
    %44 = vector.load %arg9[%c0_20, %c0_21] : memref<1x32xf32, #tpu.memory_space<vmem>>, vector<1x32xf32>
    %45 = vector.broadcast %44 : vector<1x32xf32> to vector<8x32xf32>
    %46 = arith.addf %43, %45 : vector<8x32xf32>
    %47 = vector.shape_cast %46 : vector<8x32xf32> to vector<1x8x32xf32>
    %c0_22 = arith.constant 0 : index
    %c0_23 = arith.constant 0 : index
    %c0_24 = arith.constant 0 : index
    %48 = vector.load %arg10[%c0_22, %c0_23, %c0_24] : memref<1x8x32xf32, #tpu.memory_space<vmem>>, vector<1x8x32xf32>
    tpu.vector_store %arg10[%c0_22, %c0_23, %c0_24], %47 {strides = array<i32>} : memref<1x8x32xf32, #tpu.memory_space<vmem>>, vector<1x8x32xf32>,
    %49 = vector.extract_strided_slice %30 {offsets = [0, 0, 0], sizes = [1, 8, 16], strides = [1, 1, 1]} : vector<4x8x16xf32> to vector<1x8x16xf32>
    %50 = vector.extract_strided_slice %30 {offsets = [1, 0, 0], sizes = [1, 8, 16], strides = [1, 1, 1]} : vector<4x8x16xf32> to vector<1x8x16xf32>
    %51 = arith.addf %49, %50 : vector<1x8x16xf32>
    %52 = vector.extract_strided_slice %30 {offsets = [2, 0, 0], sizes = [1, 8, 16], strides = [1, 1, 1]} : vector<4x8x16xf32> to vector<1x8x16xf32>
    %53 = arith.addf %51, %52 : vector<1x8x16xf32>
    %54 = vector.extract_strided_slice %30 {offsets = [3, 0, 0], sizes = [1, 8, 16], strides = [1, 1, 1]} : vector<4x8x16xf32> to vector<1x8x16xf32>
    %55 = arith.addf %53, %54 : vector<1x8x16xf32>
    %cst_25 = arith.constant 2.500000e-01 : f32
    %56 = vector.broadcast %cst_25 : f32 to vector<1x8x16xf32>
    %57 = arith.mulf %55, %56 : vector<1x8x16xf32>
    %c0_26 = arith.constant 0 : index
    %c0_27 = arith.constant 0 : index
    %c0_28 = arith.constant 0 : index
    %58 = vector.load %arg11[%c0_26, %c0_27, %c0_28] : memref<1x8x16xf32, #tpu.memory_space<vmem>>, vector<1x8x16xf32>
    tpu.vector_store %arg11[%c0_26, %c0_27, %c0_28], %57 {strides = array<i32>} : memref<1x8x16xf32, #tpu.memory_space<vmem>>, vector<1x8x16xf32>,
    return
  }
  func.func @transform_0(%arg0: i32, %arg1: i32) -> (i32, i32, i32) {
    %c0_i32 = arith.constant 0 : i32
    %c0_i32_0 = arith.constant 0 : i32
    return %arg0, %arg1, %c0_i32 : i32, i32, i32
  }
  func.func @transform_1(%arg0: i32, %arg1: i32) -> (i32, i32, i32) {
    %c0_i32 = arith.constant 0 : i32
    %c0_i32_0 = arith.constant 0 : i32
    %c0_i32_1 = arith.constant 0 : i32
    return %arg0, %c0_i32, %c0_i32_0 : i32, i32, i32
  }
  func.func @transform_2(%arg0: i32, %arg1: i32) -> (i32, i32) {
    %c0_i32 = arith.constant 0 : i32
    %c0_i32_0 = arith.constant 0 : i32
    %c0_i32_1 = arith.constant 0 : i32
    return %c0_i32, %c0_i32_0 : i32, i32
  }
  func.func @transform_3(%arg0: i32, %arg1: i32) -> (i32, i32) {
    %c0_i32 = arith.constant 0 : i32
    %c0_i32_0 = arith.constant 0 : i32
    %c0_i32_1 = arith.constant 0 : i32
    return %c0_i32, %c0_i32_0 : i32, i32
  }
  func.func @transform_4(%arg0: i32, %arg1: i32) -> (i32, i32) {
    %c0_i32 = arith.constant 0 : i32
    %c0_i32_0 = arith.constant 0 : i32
    %c0_i32_1 = arith.constant 0 : i32
    return %c0_i32, %c0_i32_0 : i32, i32
  }
  func.func @transform_5(%arg0: i32, %arg1: i32) -> (i32, i32) {
    %c0_i32 = arith.constant 0 : i32
    %c0_i32_0 = arith.constant 0 : i32
    %c0_i32_1 = arith.constant 0 : i32
    return %c0_i32, %c0_i32_0 : i32, i32
  }
  func.func @transform_6(%arg0: i32, %arg1: i32) -> (i32, i32) {
    %c0_i32 = arith.constant 0 : i32
    %c0_i32_0 = arith.constant 0 : i32
    %c0_i32_1 = arith.constant 0 : i32
    return %c0_i32, %c0_i32_0 : i32, i32
  }
  func.func @transform_7(%arg0: i32, %arg1: i32) -> (i32, i32) {
    %c0_i32 = arith.constant 0 : i32
    %c0_i32_0 = arith.constant 0 : i32
    %c0_i32_1 = arith.constant 0 : i32
    return %c0_i32, %c0_i32_0 : i32, i32
  }
  func.func @transform_8(%arg0: i32, %arg1: i32) -> (i32, i32, i32) {
    %c0_i32 = arith.constant 0 : i32
    %c0_i32_0 = arith.constant 0 : i32
    return %arg0, %arg1, %c0_i32 : i32, i32, i32
  }
  func.func @transform_9(%arg0: i32, %arg1: i32) -> (i32, i32, i32) {
    %c0_i32 = arith.constant 0 : i32
    %c0_i32_0 = arith.constant 0 : i32
    return %arg0, %arg1, %c0_i32 : i32, i32, i32
  }
}

</mosaic_0001>

<bundles_post_ra>
// kernel: tpu_custom_call.1
= control target key start
LH: loop header
LB: loop body
LE: loop exit
PB: predicated region body
PF: predicated region fallthrough
CT: control target
= control target key end

     0   :  { %s2028_s0 = inlined_call_operand.hbm [shape: f32[2,8,32], index: 0, kind: input, shape index: {}]   ;;  %s2029_s1 = inlined_call_operand.hbm [shape: f32[2,16,48], index: 1, kind: input, shape index: {}]   ;;  %s2030_s2 = inlined_call_operand.hbm [shape: f32[32,32], index: 2, kind: input, shape index: {}]   ;;  %s2031_s3 = inlined_call_operand.vmem [shape: f32[1,32], index: 3, kind: input, shape index: {}]   ;;  %s2032_s4 = inlined_call_operand.hbm [shape: f32[48,64], index: 4, kind: input, shape index: {}]   ;;  %s2033_s5 = inlined_call_operand.vmem [shape: f32[1,64], index: 5, kind: input, shape index: {}]   ;;  %s2034_s6 = inlined_call_operand.hbm [shape: f32[32,32], index: 6, kind: input, shape index: {}]   ;;  %s2035_s7 = inlined_call_operand.vmem [shape: f32[1,32], index: 7, kind: input, shape index: {}]   ;;  %s2036_s8 = inlined_call_operand.hbm [shape: f32[2,8,32], index: 8, kind: output, shape index: {0}]   ;;  %s2037_s9 = inlined_call_operand.hbm [shape: f32[2,8,16], index: 9, kind: output, shape index: {1}]  }
   0x1   :  { %2045 = sst [smem:[#allocation27_spill]] %s2030_s2 }
   0x2   :  { %2046 = sst [smem:[#allocation28_spill]] %s2032_s4 }
   0x3   :  { %2047 = sst [smem:[#allocation29_spill]] %s2034_s6 }
   0x4   :  { %2048 = sst [smem:[#allocation30_spill]] %s2035_s7 }
   0x5   :  { %2049 = sst [smem:[#allocation31_spill]] %s2036_s8 }
   0x6   :  { %15 = vsyncpa [#allocation5], 0 }
   0x7   :  { %17 = vsyncpa [#allocation5 + $0x1], 0 }
   0x8   :  { %18 = vsyncpa [#allocation8], 0 }
   0x9   :  { %20 = vsyncpa [#allocation8 + $0x1], 0 }
   0xa   :  { %21 = vsyncpa [#allocation11], 0 }
   0xb   :  { %22 = vsyncpa [#allocation6], 0 }
   0xc   :  { %24 = vsyncpa [#allocation6 + $0x1], 0 }
   0xd   :  { %25 = vsyncpa [#allocation15], 0 }
   0xe   :  { %27 = vsyncpa [#allocation15 + $0x1], 0  ;;  %s1721_s30 = smov 0   ;;  %s1723_s10 = smov 0  }
   0xf   :  { %s1725_s11 = smov 0   ;;  %s1727_s12 = smov 0  }
  0x10   :  { %s1729_s13 = smov 0   ;;  %s1731_s14 = smov 0  }
  0x11 LB: > { %2050 = sst [smem:[#allocation22_spill]] %s1634_s30  ;;  %s1752_s15 = sadd.s32 4294967295, %s1654_s14   ;;  %s1654_s14 = sphi %s1731_s14, %s33_s14   ;;  %s1650_s13 = sphi %s1729_s13, %s2076_s13   ;;  %s1646_s12 = sphi %s1727_s12, %s2075_s12   ;;  %s1642_s11 = sphi %s1725_s11, %s2071_s11   ;;  %s1638_s10 = sphi %s1723_s10, %s2074_s10   ;;  %s1634_s30 = sphi %s1721_s30, %s2073_s30  }
  0x12   : > { %2051 = sst [smem:[#allocation23_spill]] %s1642_s11  ;;  %p1199_p0 = scmp.ge.s32.totalorder %s1654_s14, 1 }
  0x13   : > { %p68_p1 = scmp.eq.s32.totalorder %s1752_s15, 0  ;;  %p286_p2 = scmp.lt.s32.totalorder %s1654_s14, 3 }
  0x14   : > { %s2052_s2 = sld [smem:[#allocation27_spill]]  ;;  %s1656_s20 = smov [#allocation9]  }
  0x15   : > { %p1760_p3 = pnand %p1199_p0, %p286_p2  ;;  %s299_s21 = sshll.u32 %s1656_s20, 4  ;;  %s300_s21 = int_to_ptr.vmem [resolvable:$true] %s299_s21 }
  0x16   : > { %p1203_p6 = scmp.ge.s32.totalorder %s1654_s14, 2  ;;  %s2055_s4 = sld [smem:[#allocation28_spill]] }
  0x17   : > { %p1264_p4 = pneg %p1760_p3  ;;  %s2038_s26 = smov 128  }
  0x18   : > { %s2039_s27 = smov 8   ;;  %s1659_s28 = smov [#allocation10]  }
  0x19   : > { %p1768_p5 = pnand %p1264_p4, %p68_p1  ;;  %s316_s29 = sshll.u32 %s1659_s28, 4  ;;  %s317_s29 = int_to_ptr.vmem [resolvable:$true] %s316_s29 }
  0x1a   : > { %s297_s18 = sshll.u32 %s2052_s2, 4  ;;  %s2056_s6 = sld [smem:[#allocation29_spill]]  ;;  %s298_s18 = int_to_ptr.hbm [resolvable:$true] %s297_s18 }
  0x1b   : > { %1267 = dma.hbm_to_vmem [thread:$0]  (!%p1768_p5), %s298_s18, 512, %s300_s21, [#allocation8], %s2038_s26, %s2038_s26, %s2039_s27  }
  0x1c   : > { %s314_s25 = sshll.u32 %s2055_s4, 4  ;;  %s1660_s18 = smov [#allocation12]   ;;  %s315_s25 = int_to_ptr.hbm [resolvable:$true] %s314_s25 }
  0x1d   : > { %1270 = dma.hbm_to_vmem [thread:$0]  (!%p1768_p5), %s315_s25, 768, %s317_s29, [#allocation11], %s2038_s26, %s2038_s26, %s2039_s27  }
  0x1e   : > { %s333_s21 = sshll.u32 %s1660_s18, 4  ;;  %s1198_s23 = sadd.s32 4294967294, %s1654_s14   ;;  %s334_s21 = int_to_ptr.vmem [resolvable:$true] %s333_s21 }
  0x1f   : > { %s45_s24 = sadd.s32 1, %s1650_s13  ;;  %s54_s28 = sadd.s32 1, %s1642_s11 }
  0x20   : > { %s331_s20 = sshll.u32 %s2056_s6, 4  ;;  %p47_p7 = scmp.ge.s32.totalorder %s45_s24, 2  ;;  %s332_s20 = int_to_ptr.hbm [resolvable:$true] %s331_s20 }
  0x21   : > { %1273 = dma.hbm_to_vmem [thread:$0]  (!%p1768_p5), %s332_s20, 512, %s334_s21, [#allocation11], %s2038_s26, %s2038_s26, %s2039_s27  }
  0x22   : > { %p61_p8 = scmp.ne.s32.totalorder %s1642_s11, %s1638_s10  ;;  %p62_p9 = scmp.eq.s32.totalorder %s1654_s14, 0 }
  0x23   : > { %p67_p10 = scmp.ne.s32.totalorder %s1638_s10, %s1634_s30  ;;  %s2078_s24 = smov (%p47_p7, %s45_s24), 0 }
  0x24   : > { %2057 = sst [smem:[#allocation24_spill]] %s2078_s24  ;;  %p1804_p11 = por %p62_p9, %p61_p8 }
  0x25   : > { %p1810_p12 = por %p68_p1, %p67_p10  ;;  %s49_s29 = ssub.s32 %s1650_s13, %s2078_s24 }
  0x26   : > { %p245_p13 = scmp.eq.s32.totalorder %s1752_s15, 1  ;;  %p52_p0 = scmp.eq.s32.totalorder %s49_s29, 0 }
  0x27   : > { %p251_p2 = scmp.eq.s32.totalorder %s1198_s23, 1  ;;  %p1291_p5 = scmp.lt.s32.totalorder %s1654_s14, 2 }
  0x28   : > { %p1817_p4 = por %p245_p13, %p61_p8  ;;  %s350_s18 = sand.u32 1, %s1642_s11  }
  0x29   : > { %s1823_s17 = scalar_select %p52_p0, %s1642_s11, %s54_s28  }
  0x2a   : > { %p1825_p7 = por %p251_p2, %p67_p10  ;;  %s1204_s21 = sshll.u32 %s350_s18, 3 }
  0x2b   : > { %2061 = sst [smem:[#allocation25_spill]] %s1823_s17  ;;  %s1205_s26 = sshll.u32 %s1650_s13, 3 }
  0x2c   : > { %s2062_s20 = scalar_select %p1825_p7, 1, 0 }
  0x2d   : > { %s359_s23 = scalar_lea.hbm %s2028_s0, %s1205_s26  ;;  %s354_s29 = scalar_lea.vmem [#allocation4], %s1204_s21 }
  0x2e   : > { %2063 = sst [smem:[#allocation26_spill]] %s2062_s20  ;;  %s363_s4 = sshll.u32 %s354_s29, 4  ;;  %s364_s4 = int_to_ptr.vmem [resolvable:$true] %s363_s4 }
  0x2f   : > { %s361_s6 = sshll.u32 %s359_s23, 4  ;;  %p1275_p8 = pnand %p1291_p5, %p1804_p11  ;;  %s362_s6 = int_to_ptr.hbm [resolvable:$true] %s361_s6 }
  0x30   : > { %s1206_s28 = sshll.u32 %s350_s18, 4  ;;  %s1243_s24 = sshll.u32 %s1650_s13, 4 }
  0x31   : > { %s351_s17 = scalar_lea.sflag [#allocation5], %s350_s18  ;;  %s374_s20 = scalar_lea.vmem [#allocation7], %s1206_s28 }
  0x32   : > { %1277 = dma.hbm_to_vmem [thread:$0]  (!%p1275_p8), %s362_s6, 128, %s364_s4, %s351_s17  }
  0x33   : > { %s382_s11 = sshll.u32 %s374_s20, 4  ;;  %s370_s30 = sand.u32 1, %s1654_s14   ;;  %s383_s11 = int_to_ptr.vmem [resolvable:$true] %s382_s11 }
  0x34   : > { %s379_s2 = scalar_lea.hbm %s2029_s1, %s1243_s24  ;;  %s371_s27 = scalar_lea.sflag [#allocation8], %s370_s30 }
  0x35   : > { %s380_s26 = sshll.u32 %s379_s2, 4  ;;  %s2064_s21 = smov 8   ;;  %s381_s26 = int_to_ptr.hbm [resolvable:$true] %s380_s26 }
  0x36   : > { %s2065_s23 = smov 128   ;;  %394 = sbr.rel (%p1760_p3) target bundleno = 1131 (0x46b), region = 52 }
  0x37   : > { %1280 = dma.hbm_to_vmem [thread:$0]  (!%p1275_p8), %s381_s26, 256, %s383_s11, %s371_s27, %s2065_s23, %s2065_s23, %s2064_s21  }
  0x38   : > { %s1847_s4 = sand.u32 (!%p1760_p3), 1, %s1638_s10  }
  0x39   : > { %s1850_s6 = sshll.u32 (!%p1760_p3), %s1847_s4, 3  ;;  %s397_s7 = scalar_lea.sflag (!%p1760_p3), [#allocation5], %s1847_s4 }
  0x3a   : > { %s400_s8 = scalar_lea.vmem (!%p1760_p3), [#allocation4], %s1850_s6 }
  0x3b   : > { %1609 = dma.done.wait (%p1810_p12), %s397_s7, 128  }
  0x3c   : > { %1611 = vsyncadd (%p1810_p12), %s397_s7, 4294967168  ;;  %s406_s30 = sand.u32 1, %s1752_s15   ;;  %s1211_s11 = sshll.u32 %s1847_s4, 4 }
  0x3d   : > { %s407_s19 = scalar_lea.sflag [#allocation8], %s406_s30  ;;  %s1860_s24 = scalar_lea.vmem [#allocation7], %s1211_s11 }
  0x3e   : > { %1613 = dma.done.wait (%p1810_p12), %s407_s19, 256  }
  0x3f   : > { %1615 = vsyncadd (%p1810_p12), %s407_s19, 4294967040 }
  0x40   : > { %1617 = dma.done.wait (%p68_p1), [#allocation8], 512  }
  0x41   : > { %1619 = vsyncadd (%p68_p1), [#allocation8], 4294966784 }
  0x42   : > { %1621 = dma.done.wait (%p68_p1), [#allocation11], 1280  }
  0x43   : > { %1623 = vsyncadd (%p68_p1), [#allocation11], 4294966016  ;;  %v482_v0 = vld [vmem:[#allocation10 + $0x28] sm:$0xff]  ;;  %v481_v1 = vld [vmem:[#allocation10 + $0x20] sm:$0xff]  ;;  %vm593_vm0 = vcmask 261120   ;;  %vm487_vm1 = vcmask 392192  }
  0x44   : > { %504 = vmatpush.msra.mxu0 %v482_v0  ;;  %v480_v2 = vld [vmem:[#allocation10 + $0x18] sm:$0xff]  ;;  %v587_v4 = vld [vmem:[#allocation9 + $0x10] sm:$0xff]  ;;  %v586_v6 = vld [vmem:[#allocation9 + $0x8] sm:$0xff]  ;;  %vm517_vm2 = vcmask 64512   ;;  %s1661_s25 = smov 120   ;;  %s1662_s17 = smov 104  }
  0x45   : > { %v588_v3 = vld [vmem:[#allocation9 + $0x18] sm:$0xff]  ;;  %v479_v5 = vld [vmem:[#allocation10 + $0x10] sm:$0xff]  ;;  %v478_v7 = vld [vmem:[#allocation10 + $0x8] sm:$0xff]  ;;  %s1663_s20 = smov 112   ;;  %vm745_vm3 = vcmask 130048   ;;  %s1664_s28 = smov 96  }
  0x46   : > { %505 = vmatpush.msra.mxu0 %v481_v1  ;;  %609 = vmatpush.msra.mxu1 %v588_v3  ;;  %v585_v8 = vld [vmem:[#allocation9] sm:$0xff]  ;;  %v584_v9 = vld [vmem:[%s400_s8] sm:$0xff]  ;;  %s1665_s2 = smov 72   ;;  %s1666_s26 = smov 88  }
  0x47   : > { %v477_v10 = vld [vmem:[#allocation10] sm:$0xff]  ;;  %v476_v12 = vld [vmem:[%s1860_s24 + $0x8] sm:$0xff]  ;;  %v1359_v13 = vld [vmem:[%s2033_s5] ss:$0 sm:$0xff]  ;;  %s1667_s27 = smov 80   ;;  %s470_s21 = scalar_lea.vmem [#allocation14], %s1850_s6 }
  0x48   : > { %506 = vmatpush.msra.mxu0 %v480_v2  ;;  %610 = vmatpush.msra.mxu1 %v587_v4  ;;  %v475_v11 = vld [vmem:[%s1860_s24] sm:$0xff]  ;;  %s1668_s23 = smov 24   ;;  %s1669_s7 = smov 16  }
  0x49   : > { %v1360_v18 = vld [vmem:[%s2031_s3] ss:$0 sm:$0xff]  ;;  %s1670_s8 = smov 8   ;;  %s1239_s30 = sshll.u32 %s1646_s12, 3 }
  0x4a   : > { %507 = vmatpush.msra.mxu0 %v479_v5  ;;  %611 = vmatpush.msra.mxu1 %v586_v6  ;;  %s1027_s24 = scalar_lea.hbm %s2037_s9, %s1239_s30  ;;  %s1029_s15 = sshll.u32 %s470_s21, 4  ;;  %s1030_s15 = int_to_ptr.vmem [resolvable:$true] %s1029_s15 }
  0x4b   : > { %s1031_s22 = sshll.u32 %s1027_s24, 4  ;;  %s1548_s29 = scalar_lea.hbm %s2037_s9, 16  ;;  %s1032_s22 = int_to_ptr.hbm [resolvable:$true] %s1031_s22 }
  0x4c   : > { %508 = vmatpush.msra.mxu0 %v478_v7  ;;  %612 = vmatpush.msra.mxu1 %v585_v8 }
  0x4d   : > { %1219 = vmatmul.msk.f32.vlgmr.msra.gmra.mxu1 %vm593_vm0, %v584_v9 }
  0x4e   : > { %509 = vmatpush.msra.mxu0 %v477_v10 }
  0x4f   : > { %1217 = vmatmul.msk.f32.vlgmr.msra.gmra.mxu0 %vm487_vm1, %v475_v11 }
  0x57   : > { %1218 = vmatmul.msk.f32.gmra.mxu0 %vm487_vm1, %v476_v12 }
  0xca   : > { %v614_v19 = vpop.f32.mrf.mxu1 }
  0xcb   : > { %v615_v20 = vadd.f32 %v1360_v18, %v614_v19 }
  0xcc   : > { %v511_v14 = vpop.f32.mrf.mxu0 }
  0xcd   : > { %v1880_v15 = vadd.f32 %v1359_v13, %v511_v14 }
  0xcf   : > { %518 = vst.msk [vmem:[#allocation2] sm:$0xff] %vm517_vm2, %v1880_v15  ;;  %530 = vrot.lane.b32.xlu2 %v1880_v15, %s1661_s25  ;;  %566 = vrot.lane.b32.xlu1 %v1880_v15, %s1662_s17 }
  0xd4   : > { %v514_v16 = vpop.f32.mrf.mxu0 }
  0xd5   : > { %v1886_v17 = vadd.f32 %v1359_v13, %v514_v16 }
  0xd6   : > { %v624_v22 = vld [vmem:[#allocation2] sm:$0xff] }
  0xd7   : > { %519 = vst.msk [vmem:[#allocation2 + $0x8] sm:$0xff] %vm517_vm2, %v1886_v17  ;;  %568 = vrot.lane.b32.xlu0 %v1886_v17, %s1662_s17  ;;  %548 = vrot.lane.b32.xlu2 %v1880_v15, %s1663_s20 }
  0xd8   : > { %550 = vrot.lane.b32.xlu1 %v1886_v17, %s1663_s20 }
  0xde   : > { %v625_v21 = vld [vmem:[#allocation2 + $0x8] sm:$0xff] }
  0xdf   : > { %532 = vrot.lane.b32.xlu0 %v1886_v17, %s1661_s25  ;;  %1220 = vmatpush.xpose.msk.msra.mxu2 %vm517_vm2, %v625_v21 }
  0xe0   : > { %620 = vrot.lane.b32.xlu2 %v615_v20, %s1663_s20  ;;  %618 = vrot.lane.b32.xlu1 %v615_v20, %s1661_s25  ;;  %s1001_s25 = scalar_lea.sflag [#allocation15], %s1847_s4 }
  0xe3   : > { %1221 = vmatpush.xpose.msk.msra.mxu2 %vm517_vm2, %v624_v22 }
  0xe6   : > { %1222 = vmatmul.msk.f32.vlgmr.msra.gmra.mxu2 %vm517_vm2, %v615_v20 }
  0xe7   : > { %622 = vrot.lane.b32.xlu0 %v615_v20, %s1662_s17  ;;  %s1542_s17 = sshra.s32 %s1032_s22, 4  ;;  %s1543_s17 = int_to_ptr.hbm [resolvable:$true] %s1542_s17 }
  0xe8   : > { %s1544_s20 = scalar_lea.hbm %s1543_s17, 8  ;;  %p1549_p10 = scmp.lt.s32.totalorder %s1543_s17, %s2037_s9 }
  0xe9   : > { %p1545_p1 = scmp.ne.s32.totalorder %s1543_s17, %s1544_s20  ;;  %p1550_p11 = scmp.lt.s32.totalorder %s1548_s29, %s1544_s20 }
  0xeb   : > { %p1546_p3 = pnand %p1545_p1, %p1817_p4  ;;  %p1551_p12 = por %p1550_p11, %p1549_p10 }
  0xed   : > { %p1547_p9 = pneg %p1546_p3 }
  0xef   : > { %p1552_p13 = pnand %p1551_p12, %p1547_p9 }
 0x129   : > { %v531_v23 = vpop.permute.xlu2 %530 }
 0x12a   : > { %537 = vst.msk [vmem:[#allocation2 + $0x10] sm:$0xff] %vm517_vm2, %v531_v23 }
 0x131   : > { %v549_v24 = vpop.permute.xlu2 %548  ;;  %v626_v36 = vld [vmem:[#allocation2 + $0x10] sm:$0xff] }
 0x132   : > { %555 = vst.msk [vmem:[#allocation2 + $0x20] sm:$0xff] %vm517_vm2, %v549_v24 }
 0x139   : > { %v628_v32 = vld [vmem:[#allocation2 + $0x20] sm:$0xff] }
 0x13a   : > { %v621_v33 = vpop.permute.xlu2 %620 }
 0x141   : > { %v567_v25 = vpop.permute.xlu1 %566 }
 0x142   : > { %573 = vst.msk [vmem:[#allocation2 + $0x30] sm:$0xff] %vm517_vm2, %v567_v25 }
 0x149   : > { %v569_v26 = vpop.permute.xlu0 %568  ;;  %v630_v31 = vld [vmem:[#allocation2 + $0x30] sm:$0xff] }
 0x14a   : > { %574 = vst.msk [vmem:[#allocation2 + $0x38] sm:$0xff] %vm517_vm2, %v569_v26  ;;  %v551_v27 = vpop.permute.xlu1 %550 }
 0x14b   : > { %556 = vst.msk [vmem:[#allocation2 + $0x28] sm:$0xff] %vm517_vm2, %v551_v27 }
 0x151   : > { %v533_v28 = vpop.permute.xlu0 %532  ;;  %v631_v29 = vld [vmem:[#allocation2 + $0x38] sm:$0xff] }
 0x152   : > { %538 = vst.msk [vmem:[#allocation2 + $0x18] sm:$0xff] %vm517_vm2, %v533_v28  ;;  %v629_v30 = vld [vmem:[#allocation2 + $0x28] sm:$0xff]  ;;  %1229 = vmatpush.xpose.msk.msrb.mxu2 %vm517_vm2, %v631_v29  ;;  %v619_v37 = vpop.permute.xlu1 %618 }
 0x153   : > { %1226 = vmatpush.xpose.msk.msrb.mxu1 %vm517_vm2, %v629_v30 }
 0x156   : > { %1230 = vmatpush.xpose.msk.msrb.mxu2 %vm517_vm2, %v630_v31 }
 0x157   : > { %1227 = vmatpush.xpose.msk.msrb.mxu1 %vm517_vm2, %v628_v32 }
 0x159   : > { %v623_v34 = vpop.permute.xlu0 %622  ;;  %v627_v35 = vld [vmem:[#allocation2 + $0x18] sm:$0xff] }
 0x15a   : > { %1228 = vmatmul.msk.f32.vlgmr.msrb.gmra.mxu1 %vm517_vm2, %v621_v33  ;;  %1223 = vmatpush.xpose.msk.msra.mxu3 %vm517_vm2, %v627_v35 }
 0x15b   : > { %1231 = vmatmul.msk.f32.vlgmr.msrb.gmra.mxu2 %vm517_vm2, %v623_v34 }
 0x15e   : > { %1224 = vmatpush.xpose.msk.msra.mxu3 %vm517_vm2, %v626_v36 }
 0x161   : > { %1225 = vmatmul.msk.f32.vlgmr.msra.gmra.mxu3 %vm517_vm2, %v619_v37 }
 0x169   : > { %v658_v38 = vpop.f32.mrf.mxu2 }
 0x16a   : > { %v746_v39 = vsel %vm745_vm3, %v658_v38, -inf }
 0x16b   : > { %747 = vmax.xlane.f32.xlu0 %v746_v39 }
 0x17f   : > { %524 = vrot.lane.b32.xlu0 %v1886_v17, %s1664_s28 }
 0x1d7   : > { %v714_v40 = vpop.f32.mrf.mxu1 }
 0x1d8   : > { %v752_v41 = vsel %vm745_vm3, %v714_v40, -inf }
 0x1d9   : > { %753 = vmax.xlane.f32.xlu1 %v752_v41 }
 0x1de   : > { %v742_v42 = vpop.f32.mrf.mxu2  ;;  %v748_v43 = vpop.xlane.xlu0 %747 }
 0x1df   : > { %v758_v44 = vsub.f32 %v658_v38, %v748_v43  ;;  %v755_v45 = vsel %vm745_vm3, %v742_v42, -inf }
 0x1e0   : > { %756 = vmax.xlane.f32.xlu2 %v755_v45 }
 0x1e1   : > { %v762_v46 = vmul.f32 1.442695, %v758_v44 }
 0x1e3   : > { %1362 = vpow2.f32 %v762_v46 }
 0x1e4   : > { %v686_v47 = vpop.f32.mrf.mxu3 }
 0x1e5   : > { %v749_v48 = vsel %vm745_vm3, %v686_v47, -inf }
 0x1e8   : > { %750 = vmax.xlane.f32.xlu2 %v749_v48 }
 0x1e9   : > { %v1363_v49 = vpop.eup %1362 }
 0x1ea   : > { %v770_v50 = vsel %vm745_vm3, %v1363_v49, 0.0 }
 0x1eb   : > { %771 = vadd.xlane.f32.xlu0 %v770_v50 }
 0x1f1   : > { %v525_v51 = vpop.permute.xlu0 %524 }
 0x1f2   : > { %522 = vrot.lane.b32.xlu1 %v1880_v15, %s1664_s28  ;;  %529 = vst.msk [vmem:[#allocation3 + $0x8] sm:$0xff] %vm517_vm2, %v525_v51 }
 0x1f9   : > { %v843_v52 = vld [vmem:[#allocation3 + $0x8] sm:$0xff] }
 0x1fa   : > { %867 = vmatpush.msrb.mxu3 %v843_v52 }
 0x1ff   : > { %577 = vrot.lane.b32.xlu0 %v1886_v17, %s1665_s2 }
 0x207   : > { %575 = vrot.lane.b32.xlu0 %v1880_v15, %s1665_s2 }
 0x20f   : > { %539 = vrot.lane.b32.xlu0 %v1880_v15, %s1666_s26 }
 0x24c   : > { %v754_v53 = vpop.xlane.xlu1 %753 }
 0x24d   : > { %v760_v54 = vsub.f32 %v714_v40, %v754_v53 }
 0x24f   : > { %v766_v55 = vmul.f32 1.442695, %v760_v54 }
 0x251   : > { %1364 = vpow2.f32 %v766_v55 }
 0x253   : > { %v757_v56 = vpop.xlane.xlu2 %756 }
 0x254   : > { %v761_v57 = vsub.f32 %v742_v42, %v757_v56 }
 0x256   : > { %v768_v58 = vmul.f32 1.442695, %v761_v57 }
 0x257   : > { %v1927_v59 = vpop.eup %1364 }
 0x258   : > { %1366 = vpow2.f32 %v768_v58  ;;  %v776_v60 = vsel %vm745_vm3, %v1927_v59, 0.0 }
 0x259   : > { %777 = vadd.xlane.f32.xlu1 %v776_v60 }
 0x25b   : > { %v751_v61 = vpop.xlane.xlu2 %750 }
 0x25c   : > { %v759_v62 = vsub.f32 %v686_v47, %v751_v61 }
 0x25e   : > { %v1931_v63 = vpop.eup %1366  ;;  %v764_v0 = vmul.f32 1.442695, %v759_v62  ;;  %v772_v1 = vpop.xlane.xlu0 %771 }
 0x25f   : > { %1368 = vrcp.f32 %v772_v1  ;;  %v779_v2 = vsel %vm745_vm3, %v1931_v63, 0.0  ;;  %v793_v9 = vand.u32 2147483648, %v772_v1  ;;  %v791_v11 = vand.u32 2147483647, %v772_v1 }
 0x260   : > { %1370 = vpow2.f32 %v764_v0  ;;  %780 = vadd.xlane.f32.xlu2 %v779_v2  ;;  %vm787_vm5 = vweird.f32 %v772_v1 }
 0x261   : > { %v794_v14 = vor.u32 1.1754944e-38, %v793_v9  ;;  %vm792_vm7 = vcmp.eq.f32.partialorder %v791_v11, 8.507059e+37  ;;  %v960_v11 = vld [vmem:[#allocation12 + $0x10] sm:$0xff] }
 0x264   : > { %v523_v3 = vpop.permute.xlu1 %522 }
 0x265   : > { %v1369_v4 = vpop.eup %1368  ;;  %528 = vst.msk [vmem:[#allocation3] sm:$0xff] %vm517_vm2, %v523_v3 }
 0x266   : > { %v1936_v5 = vpop.eup %1370  ;;  %v783_v6 = vmul.f32 %v1369_v4, %v772_v1  ;;  %vm788_vm4 = vweird.f32 %v1369_v4 }
 0x267   : > { %v773_v7 = vsel %vm745_vm3, %v1936_v5, 0.0  ;;  %vm789_vm6 = vmor %vm787_vm5, %vm788_vm4 }
 0x268   : > { %v784_v8 = vsub.f32 1.0, %v783_v6  ;;  %774 = vadd.xlane.f32.xlu2 %v773_v7 }
 0x26a   : > { %v785_v10 = vmul.f32 %v1369_v4, %v784_v8 }
 0x26c   : > { %v786_v12 = vadd.f32 %v1369_v4, %v785_v10  ;;  %v842_v13 = vld [vmem:[#allocation3] sm:$0xff]  ;;  %v961_v10 = vld [vmem:[#allocation12 + $0x18] sm:$0xff] }
 0x26d   : > { %868 = vmatpush.msrb.mxu3 %v842_v13  ;;  %981 = vmatpush.msrb.mxu0 %v961_v10  ;;  %v958_v13 = vld [vmem:[#allocation12] sm:$0xff] }
 0x26e   : > { %v790_v16 = vsel %vm789_vm6, %v1369_v4, %v786_v12  ;;  %v959_v12 = vld [vmem:[#allocation12 + $0x8] sm:$0xff] }
 0x26f   : > { %v795_v18 = vsel %vm792_vm7, %v794_v14, %v790_v16  ;;  %982 = vmatpush.msrb.mxu0 %v960_v11  ;;  %vm956_vm7 = vcmask 195584  }
 0x270   : > { %v1940_v19 = vmul.f32 %v1363_v49, %v795_v18 }
 0x271   : > { %v578_v20 = vpop.permute.xlu0 %577  ;;  %983 = vmatpush.msrb.mxu0 %v959_v12 }
 0x272   : > { %557 = vrot.lane.b32.xlu1 %v1880_v15, %s1667_s27  ;;  %583 = vst.msk [vmem:[#allocation3 + $0x38] sm:$0xff] %vm517_vm2, %v578_v20  ;;  %1232 = vmatmul.msk.f32.vlgmr.msrb.gmra.mxu3 %vm745_vm3, %v1940_v19 }
 0x273   : > { %984 = vmatpush.msrb.mxu0 %v958_v13 }
 0x279   : > { %v576_v21 = vpop.permute.xlu0 %575  ;;  %v849_v22 = vld [vmem:[#allocation3 + $0x38] sm:$0xff] }
 0x27a   : > { %541 = vrot.lane.b32.xlu1 %v1886_v17, %s1666_s26  ;;  %582 = vst.msk [vmem:[#allocation3 + $0x30] sm:$0xff] %vm517_vm2, %v576_v21  ;;  %936 = vmatpush.msra.mxu3 %v849_v22 }
 0x280   : > { %559 = vrot.lane.b32.xlu2 %v1886_v17, %s1667_s27 }
 0x281   : > { %v540_v23 = vpop.permute.xlu0 %539  ;;  %v848_v24 = vld [vmem:[#allocation3 + $0x30] sm:$0xff] }
 0x282   : > { %546 = vst.msk [vmem:[#allocation3 + $0x10] sm:$0xff] %vm517_vm2, %v540_v23  ;;  %937 = vmatpush.msra.mxu3 %v848_v24 }
 0x289   : > { %v844_v6 = vld [vmem:[#allocation3 + $0x10] sm:$0xff] }
 0x2cc   : > { %v778_v15 = vpop.xlane.xlu1 %777 }
 0x2cd   : > { %1372 = vrcp.f32 %v778_v15  ;;  %v821_v44 = vand.u32 2147483648, %v778_v15  ;;  %vm815_vm13 = vweird.f32 %v778_v15  ;;  %v819_v46 = vand.u32 2147483647, %v778_v15 }
 0x2cf   : > { %v822_v53 = vor.u32 1.1754944e-38, %v821_v44  ;;  %vm820_vm1 = vcmp.eq.f32.partialorder %v819_v46, 8.507059e+37 }
 0x2d3   : > { %v781_v25 = vpop.xlane.xlu2 %780  ;;  %v1373_v26 = vpop.eup %1372 }
 0x2d4   : > { %1374 = vrcp.f32 %v781_v25  ;;  %v811_v27 = vmul.f32 %v1373_v26, %v778_v15  ;;  %v835_v33 = vand.u32 2147483648, %v781_v25  ;;  %v833_v35 = vand.u32 2147483647, %v781_v25 }
 0x2d5   : > { %vm829_vm9 = vweird.f32 %v781_v25  ;;  %vm816_vm10 = vweird.f32 %v1373_v26 }
 0x2d6   : > { %v812_v29 = vsub.f32 1.0, %v811_v27  ;;  %v836_v38 = vor.u32 1.1754944e-38, %v835_v33  ;;  %vm834_vm12 = vcmp.eq.f32.partialorder %v833_v35, 8.507059e+37  ;;  %vm817_vm14 = vmor %vm815_vm13, %vm816_vm10 }
 0x2d8   : > { %v813_v34 = vmul.f32 %v1373_v26, %v812_v29 }
 0x2da   : > { %v1375_v28 = vpop.eup %1374  ;;  %v814_v39 = vadd.f32 %v1373_v26, %v813_v34 }
 0x2db   : > { %v825_v30 = vmul.f32 %v1375_v28, %v781_v25  ;;  %v775_v31 = vpop.xlane.xlu2 %774  ;;  %vm830_vm8 = vweird.f32 %v1375_v28 }
 0x2dc   : > { %1376 = vrcp.f32 %v775_v31  ;;  %vm831_vm11 = vmor %vm829_vm9, %vm830_vm8  ;;  %v807_v49 = vand.u32 2147483648, %v775_v31  ;;  %v818_v50 = vsel %vm817_vm14, %v1373_v26, %v814_v39  ;;  %v805_v52 = vand.u32 2147483647, %v775_v31 }
 0x2dd   : > { %v826_v32 = vsub.f32 1.0, %v825_v30  ;;  %vm801_vm4 = vweird.f32 %v775_v31  ;;  %v823_v55 = vsel %vm820_vm1, %v822_v53, %v818_v50 }
 0x2de   : > { %v808_v56 = vor.u32 1.1754944e-38, %v807_v49  ;;  %vm806_vm6 = vcmp.eq.f32.partialorder %v805_v52, 8.507059e+37 }
 0x2df   : > { %v827_v17 = vmul.f32 %v1375_v28, %v826_v32 }
 0x2e1   : > { %v828_v36 = vadd.f32 %v1375_v28, %v827_v17 }
 0x2e2   : > { %v1377_v37 = vpop.eup %1376 }
 0x2e3   : > { %v832_v40 = vsel %vm831_vm11, %v1375_v28, %v828_v36  ;;  %v797_v41 = vmul.f32 %v1377_v37, %v775_v31  ;;  %v560_v42 = vpop.permute.xlu2 %559  ;;  %vm802_vm15 = vweird.f32 %v1377_v37 }
 0x2e4   : > { %v558_v43 = vpop.permute.xlu1 %557  ;;  %v837_v45 = vsel %vm834_vm12, %v836_v38, %v832_v40  ;;  %565 = vst.msk [vmem:[#allocation3 + $0x28] sm:$0xff] %vm517_vm2, %v560_v42  ;;  %vm803_vm5 = vmor %vm801_vm4, %vm802_vm15 }
 0x2e5   : > { %v798_v47 = vsub.f32 1.0, %v797_v41  ;;  %564 = vst.msk [vmem:[#allocation3 + $0x20] sm:$0xff] %vm517_vm2, %v558_v43  ;;  %v841_v48 = vmul.f32 %v1931_v63, %v837_v45  ;;  %v840_v63 = vmul.f32 %v1927_v59, %v823_v55 }
 0x2e7   : > { %v799_v51 = vmul.f32 %v1377_v37, %v798_v47  ;;  %1235 = vmatmul.msk.f32.vlgmr.msra.gmra.mxu3 %vm745_vm3, %v841_v48 }
 0x2e9   : > { %v800_v54 = vadd.f32 %v1377_v37, %v799_v51 }
 0x2eb   : > { %v804_v57 = vsel %vm803_vm5, %v1377_v37, %v800_v54  ;;  %v847_v60 = vld [vmem:[#allocation3 + $0x28] sm:$0xff] }
 0x2ec   : > { %v542_v58 = vpop.permute.xlu1 %541  ;;  %v809_v61 = vsel %vm806_vm6, %v808_v56, %v804_v57  ;;  %913 = vmatpush.msra.mxu2 %v847_v60  ;;  %v846_v62 = vld [vmem:[#allocation3 + $0x20] sm:$0xff] }
 0x2ed   : > { %547 = vst.msk [vmem:[#allocation3 + $0x18] sm:$0xff] %vm517_vm2, %v542_v58  ;;  %v839_v0 = vmul.f32 %v1936_v5, %v809_v61 }
 0x2ee   : > { %914 = vmatpush.msra.mxu2 %v846_v62 }
 0x2ef   : > { %1234 = vmatmul.msk.f32.vlgmr.msra.gmra.mxu2 %vm745_vm3, %v840_v63  ;;  %v990_v1 = vadd.f32 %v839_v0, %v1940_v19 }
 0x2f1   : > { %v991_v2 = vadd.f32 %v990_v1, %v840_v63 }
 0x2f3   : > { %v992_v4 = vadd.f32 %v991_v2, %v841_v48 }
 0x2f4   : > { %v845_v3 = vld [vmem:[#allocation3 + $0x18] sm:$0xff] }
 0x2f5   : > { %890 = vmatpush.msra.mxu1 %v845_v3  ;;  %v993_v7 = vmul.f32 0.25, %v992_v4  ;;  %v870_v59 = vpop.f32.mrf.mxu3 }
 0x2f7   : > { %891 = vmatpush.msra.mxu1 %v844_v6  ;;  %994 = vst.msk [vmem:[%s470_s21] sm:$0xff] %vm745_vm3, %v993_v7 }
 0x2f8   : > { %1233 = vmatmul.msk.f32.vlgmr.msra.gmra.mxu1 %vm745_vm3, %v839_v0 }
 0x36a   : > { %v939_v5 = vpop.f32.mrf.mxu3 }
 0x36b   : > { %951 = vrot.lane.b32.xlu0 %v939_v5, %s1668_s23 }
 0x372   : > { %v916_v8 = vpop.f32.mrf.mxu2 }
 0x373   : > { %947 = vrot.lane.b32.xlu1 %v916_v8, %s1669_s7 }
 0x375   : > { %v893_v9 = vpop.f32.mrf.mxu1 }
 0x376   : > { %943 = vrot.lane.b32.xlu2 %v893_v9, %s1670_s8 }
 0x3d0   : > { %v944_v14 = vpop.permute.xlu2 %943 }
 0x3d1   : > { %v954_v16 = vsel %vm517_vm2, %v870_v59, %v944_v14 }
 0x3dd   : > { %v952_v19 = vpop.permute.xlu0 %951 }
 0x3e5   : > { %v948_v18 = vpop.permute.xlu1 %947 }
 0x3e6   : > { %v955_v20 = vsel %vm745_vm3, %v954_v16, %v948_v18 }
 0x3e7   : > { %v957_v21 = vsel %vm956_vm7, %v955_v20, %v952_v19 }
 0x3e8   : > { %1236 = vmatmul.msk.f32.vlgmr.msrb.gmra.mxu0 %vm593_vm0, %v957_v21 }
 0x3e9   : > { %1555 = shalt.err (!%p1552_p13)
}
 0x3ea   : > { %1261 = dma.vmem_to_hbm [thread:$0]  (%p1817_p4), %s1030_s15, 128, %s1032_s22, %s1001_s25  }
 0x3eb   : > { %s2066_s21 = sld [smem:[#allocation31_spill]]  ;;  %s463_s19 = scalar_lea.vmem [#allocation13], %s1850_s6 }
 0x3ec   : > { %s2067_s11 = sld [smem:[#allocation30_spill]]  ;;  %s1014_s24 = sshll.u32 %s463_s19, 4  ;;  %s1015_s24 = int_to_ptr.vmem [resolvable:$true] %s1014_s24 }
 0x3ed   : > { %s996_s20 = scalar_lea.sflag [#allocation6], %s1847_s4 }
 0x3f1   : > { %s1012_s23 = scalar_lea.hbm %s2066_s21, %s1239_s30  ;;  %s1576_s6 = scalar_lea.hbm %s2066_s21, 16 }
 0x3f2   : > { %v1361_v22 = vld [vmem:[%s2067_s11] ss:$0 sm:$0xff]  ;;  %s1016_s17 = sshll.u32 %s1012_s23, 4  ;;  %s1017_s17 = int_to_ptr.hbm [resolvable:$true] %s1016_s17 }
 0x3f3   : > { %s1570_s15 = sshra.s32 %s1017_s17, 4  ;;  %s1571_s15 = int_to_ptr.hbm [resolvable:$true] %s1570_s15 }
 0x3f4   : > { %s1572_s22 = scalar_lea.hbm %s1571_s15, 8  ;;  %p1577_p8 = scmp.lt.s32.totalorder %s1571_s15, %s2066_s21 }
 0x3f5   : > { %p1573_p0 = scmp.ne.s32.totalorder %s1571_s15, %s1572_s22  ;;  %p1578_p1 = scmp.lt.s32.totalorder %s1576_s6, %s1572_s22 }
 0x3f7   : > { %p1574_p2 = pnand %p1573_p0, %p1817_p4  ;;  %p1579_p3 = por %p1578_p1, %p1577_p8 }
 0x3f9   : > { %p1575_p5 = pneg %p1574_p2 }
 0x3fb   : > { %p1580_p9 = pnand %p1579_p3, %p1575_p5 }
 0x465   : > { %v986_v23 = vpop.f32.mrf.mxu0 }
 0x466   : > { %v987_v24 = vadd.f32 %v1361_v22, %v986_v23 }
 0x468   : > { %989 = vst.msk [vmem:[%s463_s19] sm:$0xff] %vm593_vm0, %v987_v24 }
 0x469   : > { %1583 = shalt.err (!%p1580_p9)
}
 0x46a   : > { %1260 = dma.vmem_to_hbm [thread:$0]  (%p1817_p4), %s1015_s24, 128, %s1017_s17, %s996_s20  }
 0x46b PF: > { %s2068_s4 = sld [smem:[#allocation22_spill]]  ;;  %p1282_p10 = pnand %p1203_p6, %p1825_p7 }
 0x46d   : > { %p1283_p11 = pneg %p1282_p10 }
 0x471   : > { %s1043_s28 = sand.u32 1, %s2068_s4  }
 0x472   : > { %s1044_s2 = scalar_lea.sflag [#allocation6], %s1043_s28 }
 0x473   : > { %1625 = dma.done.wait (%p1283_p11), %s1044_s2, 128  }
 0x474   : > { %1627 = vsyncadd (%p1283_p11), %s1044_s2, 4294967168  ;;  %s1054_s26 = scalar_lea.sflag [#allocation15], %s1043_s28 }
 0x475   : > { %1629 = dma.done.wait (%p1283_p11), %s1054_s26, 128  }
 0x476   : > { %1631 = vsyncadd (%p1283_p11), %s1054_s26, 4294967168  ;;  %s33_s14 = sadd.s32 1, %s1654_s14   ;;  %s2070_s16 = sld [smem:[#allocation23_spill]] }
 0x477   : > { %p30_p12 = scmp.ge.s32.totalorder %s33_s14, 4   ;;  %s2071_s11 = sld [smem:[#allocation25_spill]] }
 0x478   : > { %s2072_s27 = sld [smem:[#allocation24_spill]]  ;;  %s2073_s30 = smov %s1638_s10 }
 0x479   : > { %s2075_s12 = smov %s1650_s13 }
 0x47a   :  { %32 = sbr.rel (!%p30_p12) target bundleno = 17 (0x11), region = 149 }
 0x47c   : > { %s2074_s10 = smov %s2070_s16 }
 0x47e   : > { %s2076_s13 = smov %s2072_s27 }
 0x47f   :  { %1060 = vsyncpa [#allocation5], 1 }
 0x480   :  { %1062 = vsyncpa [#allocation5 + $0x1], 1 }
 0x481   :  { %1063 = vsyncpa [#allocation8], 1 }
 0x482   :  { %1065 = vsyncpa [#allocation8 + $0x1], 1 }
 0x483   :  { %1066 = vsyncpa [#allocation11], 1 }
 0x484   :  { %1067 = vsyncpa [#allocation6], 1 }
 0x485   :  { %1069 = vsyncpa [#allocation6 + $0x1], 1 }
 0x486   :  { %1070 = vsyncpa [#allocation15], 1 }
 0x487   :  { %1072 = vsyncpa [#allocation15 + $0x1], 1 }

</bundles_post_ra>
